<compile_context>
chip_gen: v6e
topology: v6e:2x2x1
jax: 0.10.0
libtpu: 0.0.40
codegen_flags: <defaults>
</compile_context>

<pallas_src>
from functools import partial

import jax
import jax.numpy as jnp
from jax.experimental import pallas as pl
from jax.experimental.pallas import tpu as pltpu


def _round_up(x: int, m: int) -> int:
    return (x + m - 1) // m * m


def _encoder_kernel(cat_ref, num_ref, w_ref, out_ref, *,
                    vocab_offsets, bias_col, vocab_pad, mxu_dtype):
    """One row tile of the fused encoder.

    cat_ref : (tile, num_cat)                     int32  raw per-feature indices
    num_ref : (tile, numerical_dim)               f32    raw numerical features
    w_ref   : (vocab_pad + numerical_dim, hidden) mxu dtype, folded weights:
                rows [0, total_vocab)             -> stacked folded tables T_i'
                row  bias_col (= total_vocab)     -> folded bias b'
                rows (bias_col, vocab_pad)        -> zeros (lane padding)
                rows [vocab_pad, +numerical_dim)  -> folded numerical proj W'
    out_ref : (tile, hidden)                      output dtype
    """
    rows = cat_ref.shape[0]

    # Multi-hot over the padded stacked vocabulary.  Vocab-prefix offsets are
    # Python constants (free scalar adds, no wrapper HBM pass); the bias is a
    # constant hot lane pointing at the b' row of w_ref.
    iota = jax.lax.broadcasted_iota(jnp.int32, (rows, vocab_pad), 1)
    hot = iota == bias_col
    for i, off in enumerate(vocab_offsets):
        hot = hot | (iota == cat_ref[:, i:i + 1] + off)

    # Activation [multi_hot | numerical]; the concat boundary sits exactly on
    # a 128-lane multiple (vocab_pad), so no relayout is required.  bf16 cast
    # happens here (VPU filler under MXU/DMA slack), not in the wrapper.
    act = jnp.concatenate(
        [hot.astype(mxu_dtype), num_ref[...].astype(mxu_dtype)], axis=-1)

    # Single fused MXU pass: embedding gathers + numerical projection +
    # fusion Linear + bias, accumulated in f32.
    out_ref[...] = jnp.dot(
        act, w_ref[...], preferred_element_type=jnp.float32
    ).astype(out_ref.dtype)


def tabular_feature_encoder(
    categorical,            # (B, S, num_cat) integer indices
    numerical,              # (B, S, numerical_dim) f32
    emb_tables,             # list of (vocab_i, dim_i) f32
    w_num, b_num,           # (numerical_dim, hidden), (hidden,)
    w_fus, b_fus,           # (cat_dim + hidden, hidden), (hidden,)
    *,
    tile_rows: int = 512,          # multiple of 128; sweep 512-1024
    mxu_dtype=jnp.bfloat16,        # MXU operand dtype (f32 accumulate regardless)
    out_dtype=jnp.float32,         # bf16 halves writeback if the consumer allows
):
    B, S, num_cat = categorical.shape
    numerical_dim = numerical.shape[-1]
    hidden = w_num.shape[-1]
    dims = [int(t.shape[1]) for t in emb_tables]
    vocabs = [int(t.shape[0]) for t in emb_tables]
    cat_dim = sum(dims)
    total_vocab = sum(vocabs)
    N = B * S

    # ---- Fold the fusion Linear into the other parameters (f32, once) ------
    w_fus32 = w_fus.astype(jnp.float32)
    dim_offs = [0]
    for d in dims[:-1]:
        dim_offs.append(dim_offs[-1] + d)
    folded_tables = [
        emb_tables[i].astype(jnp.float32)
        @ w_fus32[dim_offs[i]:dim_offs[i] + dims[i], :]
        for i in range(num_cat)
    ]
    t_stacked = jnp.concatenate(folded_tables, axis=0)            # (total_vocab, hidden)
    w_fus_num = w_fus32[cat_dim:, :]
    w_prime = w_num.astype(jnp.float32) @ w_fus_num               # (numerical_dim, hidden)
    b_prime = b_num.astype(jnp.float32) @ w_fus_num + b_fus.astype(jnp.float32)

    # ---- One stacked weight; vocab block padded to a 128-lane multiple -----
    bias_col = total_vocab                                        # row holding b'
    vocab_pad = _round_up(total_vocab + 1, 128)
    w_combined = jnp.concatenate(
        [t_stacked,
         b_prime[None, :],
         jnp.zeros((vocab_pad - total_vocab - 1, hidden), jnp.float32),
         w_prime],
        axis=0,
    ).astype(mxu_dtype)                                           # (vocab_pad + numerical_dim, hidden)

    # ---- Kernel launch: raw inputs, ragged last tile masked by Pallas ------
    cat2d = categorical.reshape(N, num_cat).astype(jnp.int32)     # no offset pass
    num2d = numerical.reshape(N, numerical_dim)                   # no cast pass

    tile = min(tile_rows, _round_up(N, 8))     # sublane-aligned, <= tile_rows
    grid = (pl.cdiv(N, tile),)
    # NOTE(v7x): size `tile` so the grid has >= 2 (ideally even) steps at real
    # batch sizes so both TensorCores get work; on v5e/v6e this is a no-op.

    vocab_offsets = [0]
    for v in vocabs[:-1]:
        vocab_offsets.append(vocab_offsets[-1] + v)

    kernel = partial(
        _encoder_kernel,
        vocab_offsets=tuple(vocab_offsets),
        bias_col=bias_col,
        vocab_pad=vocab_pad,
        mxu_dtype=mxu_dtype,
    )

    out = pl.pallas_call(
        kernel,
        out_shape=jax.ShapeDtypeStruct((N, hidden), out_dtype),
        grid=grid,
        in_specs=[
            pl.BlockSpec((tile, num_cat), lambda i: (i, 0)),
            pl.BlockSpec((tile, numerical_dim), lambda i: (i, 0)),
            # Resident folded weight: constant index_map, single-buffered.
            pl.BlockSpec(w_combined.shape, lambda i: (0, 0),
                         pipeline_mode=pl.Buffered(1)),
        ],
        out_specs=pl.BlockSpec((tile, hidden), lambda i: (i, 0)),
        compiler_params=pltpu.CompilerParams(
            # Row axis is embarrassingly parallel -> shards across the 2 TCs on v7x.
            dimension_semantics=("parallel",),
        ),
    )(cat2d, num2d, w_combined)

    return out.reshape(B, S, hidden)


def _reference(categorical, numerical, emb_tables, w_num, b_num, w_fus, b_fus):
    """Plain-JAX f32 reference mirroring the PyTorch forward."""
    embs = [jnp.take(t, categorical[..., i], axis=0) for i, t in enumerate(emb_tables)]
    cat_feat = jnp.concatenate(embs, axis=-1)
    num_feat = numerical @ w_num + b_num
    combined = jnp.concatenate([cat_feat, num_feat], axis=-1)
    return combined @ w_fus + b_fus


if __name__ == "__main__":
    key = jax.random.PRNGKey(0)

    # Module configuration (small, consistent with the PyTorch __init__):
    vocab_sizes = {"feat_a": 11, "feat_b": 7}
    embedding_dims = {"feat_a": 8, "feat_b": 4}
    numerical_dim = 5
    hidden_dim = 32
    cat_dim = sum(embedding_dims.values())        # 12
    fusion_in = cat_dim + hidden_dim              # 44

    B, S = 2, 8

    keys = jax.random.split(key, 10)

    # Deterministic synthetic parameters (not a checkpoint).
    emb_tables = [
        0.1 * jax.random.normal(keys[0], (vocab_sizes["feat_a"], embedding_dims["feat_a"]), jnp.float32),
        0.1 * jax.random.normal(keys[1], (vocab_sizes["feat_b"], embedding_dims["feat_b"]), jnp.float32),
    ]
    w_num = 0.1 * jax.random.normal(keys[2], (numerical_dim, hidden_dim), jnp.float32)
    b_num = 0.1 * jax.random.normal(keys[3], (hidden_dim,), jnp.float32)
    w_fus = 0.1 * jax.random.normal(keys[4], (fusion_in, hidden_dim), jnp.float32)
    b_fus = 0.1 * jax.random.normal(keys[5], (hidden_dim,), jnp.float32)

    # Inputs (the "batch" dict of the PyTorch module).
    categorical = jnp.stack(
        [
            jax.random.randint(keys[6], (B, S), 0, vocab_sizes["feat_a"]),
            jax.random.randint(keys[7], (B, S), 0, vocab_sizes["feat_b"]),
        ],
        axis=-1,
    ).astype(jnp.int32)                           # (B, S, 2)
    numerical = jax.random.normal(keys[8], (B, S, numerical_dim), jnp.float32)

    # jit the wrapper so the (tiny) reshape/fold ops fuse and don't add
    # separate HBM passes around the kernel.
    encode = jax.jit(tabular_feature_encoder)
    out = jax.block_until_ready(
        encode(categorical, numerical, emb_tables, w_num, b_num, w_fus, b_fus)
    )

    ref = _reference(categorical, numerical, emb_tables, w_num, b_num, w_fus, b_fus)
    assert out.shape == (B, S, hidden_dim), out.shape
    # bf16 MXU operands vs f32 reference -> loose but tight-enough tolerance.
    assert jnp.allclose(out, ref, atol=1e-2, rtol=1e-2), "mismatch vs reference"

    print("KERNEL_OK")
</pallas_src>

<mosaic_0001>
module attributes {stable_mosaic.version = 11 : i64} {
  func.func @_encoder_kernel(%arg0: i32, %arg1: memref<16x2xi32, #tpu.memory_space<vmem>>, %arg2: memref<16x5xf32, #tpu.memory_space<vmem>>, %arg3: memref<133x32xbf16, #tpu.memory_space<vmem>>, %arg4: memref<16x32xf32, #tpu.memory_space<vmem>>) attributes {dimension_semantics = [#tpu.dimension_semantics<parallel>], iteration_bounds = array<i64: 1>, scalar_prefetch = 0 : i64, scratch_operands = 0 : i64, tpu.core_type = #tpu.core_type<tc>, window_params = [{transform_indices = @transform_0, window_bounds = array<i64: 16, 2>}, {transform_indices = @transform_1, window_bounds = array<i64: 16, 5>}, {pipeline_mode = #tpu.pipeline_mode<synchronous>, transform_indices = @transform_2, window_bounds = array<i64: 133, 32>}, {transform_indices = @transform_3, window_bounds = array<i64: 16, 32>}]} {
    %0 = tpu.iota {dimensions = array<i32: 1>} : vector<16x128xi32>
    %c18_i32 = arith.constant 18 : i32
    %1 = vector.broadcast %c18_i32 : i32 to vector<16x128xi32>
    %2 = arith.cmpi eq, %0, %1 : vector<16x128xi32>
    %c0 = arith.constant 0 : index
    %c0_0 = arith.constant 0 : index
    %3 = vector.load %arg1[%c0, %c0_0] : memref<16x2xi32, #tpu.memory_space<vmem>>, vector<16x1xi32>
    %c0_i32 = arith.constant 0 : i32
    %4 = vector.broadcast %c0_i32 : i32 to vector<16x1xi32>
    %5 = arith.addi %3, %4 : vector<16x1xi32>
    %6 = vector.broadcast %5 : vector<16x1xi32> to vector<16x128xi32>
    %7 = arith.cmpi eq, %0, %6 : vector<16x128xi32>
    %8 = arith.ori %2, %7 : vector<16x128xi1>
    %c0_1 = arith.constant 0 : index
    %c1 = arith.constant 1 : index
    %9 = vector.load %arg1[%c0_1, %c1] : memref<16x2xi32, #tpu.memory_space<vmem>>, vector<16x1xi32>
    %c11_i32 = arith.constant 11 : i32
    %10 = vector.broadcast %c11_i32 : i32 to vector<16x1xi32>
    %11 = arith.addi %9, %10 : vector<16x1xi32>
    %12 = vector.broadcast %11 : vector<16x1xi32> to vector<16x128xi32>
    %13 = arith.cmpi eq, %0, %12 : vector<16x128xi32>
    %14 = arith.ori %8, %13 : vector<16x128xi1>
    %15 = arith.extui %14 : vector<16x128xi1> to vector<16x128xi32>
    %16 = arith.sitofp %15 : vector<16x128xi32> to vector<16x128xf32>
    %17 = arith.truncf %16 : vector<16x128xf32> to vector<16x128xbf16>
    %c0_2 = arith.constant 0 : index
    %c0_3 = arith.constant 0 : index
    %18 = vector.load %arg2[%c0_2, %c0_3] : memref<16x5xf32, #tpu.memory_space<vmem>>, vector<16x5xf32>
    %19 = arith.truncf %18 : vector<16x5xf32> to vector<16x5xbf16>
    %20 = tpu.concatenate %17, %19 in 1 : vector<16x128xbf16>, vector<16x5xbf16> -> vector<16x133xbf16>
    %c0_4 = arith.constant 0 : index
    %c0_5 = arith.constant 0 : index
    %21 = vector.load %arg3[%c0_4, %c0_5] : memref<133x32xbf16, #tpu.memory_space<vmem>>, vector<133x32xbf16>
    %cst = arith.constant dense<0.000000e+00> : vector<16x32xf32>
    %22 = tpu.matmul %20, %21, %cst {dimension_numbers = #tpu.dot_dimension_numbers<[1], [0], [0], [1], [0, 0, 1, 1], [], []>} : vector<16x133xbf16>, vector<133x32xbf16>, vector<16x32xf32> -> vector<16x32xf32>
    %c0_6 = arith.constant 0 : index
    %c0_7 = arith.constant 0 : index
    %23 = vector.load %arg4[%c0_6, %c0_7] : memref<16x32xf32, #tpu.memory_space<vmem>>, vector<16x32xf32>
    tpu.vector_store %arg4[%c0_6, %c0_7], %22 {strides = array<i32>} : memref<16x32xf32, #tpu.memory_space<vmem>>, vector<16x32xf32>,
    return
  }
  func.func @transform_0(%arg0: i32) -> (i32, i32) {
    %c0_i32 = arith.constant 0 : i32
    %c0_i32_0 = arith.constant 0 : i32
    return %arg0, %c0_i32 : i32, i32
  }
  func.func @transform_1(%arg0: i32) -> (i32, i32) {
    %c0_i32 = arith.constant 0 : i32
    %c0_i32_0 = arith.constant 0 : i32
    return %arg0, %c0_i32 : i32, i32
  }
  func.func @transform_2(%arg0: i32) -> (i32, i32) {
    %c0_i32 = arith.constant 0 : i32
    %c0_i32_0 = arith.constant 0 : i32
    %c0_i32_1 = arith.constant 0 : i32
    return %c0_i32, %c0_i32_0 : i32, i32
  }
  func.func @transform_3(%arg0: i32) -> (i32, i32) {
    %c0_i32 = arith.constant 0 : i32
    %c0_i32_0 = arith.constant 0 : i32
    return %arg0, %c0_i32 : i32, i32
  }
}

</mosaic_0001>

<bundles_post_ra>
// kernel: tabular_feature_encoder.1
= control target key start
LH: loop header
LB: loop body
LE: loop exit
PB: predicated region body
PF: predicated region fallthrough
CT: control target
= control target key end

     0   :  { %v245_v2 = vmov 0   ;;  %v246_v3 = vmov 1   ;;  %vm119_vm0 = vcmask 39936   ;;  %s314_s0 = inlined_call_operand.vmem [shape: s32[16,2], index: 0, kind: input, shape index: {}]   ;;  %s315_s1 = inlined_call_operand.vmem [shape: f32[16,5], index: 1, kind: input, shape index: {}]   ;;  %s316_s2 = inlined_call_operand.vmem [shape: bf16[133,32], index: 2, kind: input, shape index: {}]   ;;  %s317_s3 = inlined_call_operand.hbm [shape: f32[16,32], index: 3, kind: output, shape index: {}]  }
   0x1   :  { %v19_v0 = vld [vmem:[%s314_s0] sm:$0xff]  ;;  %v20_v1 = vld [vmem:[%s314_s0 + $0x8] sm:$0xff]  ;;  %211 = vset.pattern.permute.xlu0 %v245_v2  ;;  %212 = vset.pattern.permute.xlu1 %v246_v3  ;;  %v214_v5 = vld [vmem:[%s316_s2 + $0x38] sm:$0xff]  }
   0x2   :  { %v31_v4 = vadd.s32 11, %v19_v0  ;;  %22 = vperm.xlu0 %211, %v19_v0   ;;  %130 = vmatprep.subr.bf16.mxu0 %v245_v2  ;;  %v32_v6 = vadd.s32 11, %v20_v1  ;;  %v215_v7 = vld [vmem:[%s316_s2 + $0x30] sm:$0xff]   ;;  %v216_v8 = vld [vmem:[%s316_s2 + $0x28] sm:$0xff]   ;;  %v48_v9 = vld [vmem:[%s315_s1] sm:$0xff] }
   0x3   :  { %131 = vmatpush1.bf16.msra.mxu0 %v214_v5  ;;  %v49_v10 = vld [vmem:[%s315_s1 + $0x8] sm:$0xff] }
   0x4   :  { %34 = vperm.xlu1 %212, %v31_v4   ;;  %132 = vmatprep.subr.bf16.mxu0 %v245_v2  ;;  %v50_v11 = vpack.c.bf16 %v49_v10, %v48_v9 }
   0x6   :  { %25 = vperm.xlu0 %211, %v20_v1  }
   0x7   :  { %133 = vmatpush1.bf16.msra.mxu0 %v215_v7 }
   0x8   :  { %37 = vperm.xlu1 %212, %v32_v6   ;;  %134 = vmatprep.subr.bf16.mxu0 %v245_v2 }
   0xa   :  { %213 = vset.pattern.permute.xlu0 %v246_v3 }
   0xb   :  { %8 = vsyncpa [#allocation3], 0  ;;  %135 = vmatpush1.bf16.msra.mxu0 %v216_v8  ;;  %v217_v12 = vld [vmem:[%s316_s2 + $0x20] sm:$0xff]   ;;  %201 = vmatprep.mubr.msk.bf16.mxu0 %vm119_vm0, %v50_v11  ;;  %v218_v13 = vld [vmem:[%s316_s2 + $0x18] sm:$0xff]   ;;  %vm123_vm1 = vcmask 1041408   ;;  %vm124_vm2 = vcmask 1042432   ;;  %v16_v22 = vlaneseq }
   0xc   :  { %136 = vmatprep.subr.bf16.mxu0 %v245_v2  ;;  %v219_v14 = vld [vmem:[%s316_s2 + $0x10] sm:$0xff]   ;;  %v220_v15 = vld [vmem:[%s316_s2 + $0x8] sm:$0xff]   ;;  %v247_v16 = vmov 65535   ;;  %v221_v18 = vld [vmem:[%s316_s2] sm:$0xff]   ;;  %v248_v28 = vmov 1.0|1.0  }
   0xd   :  { %v125_v17 = vsel %vm123_vm1, 4294967295, %v247_v16  ;;  %v222_v19 = vld [vmem:[%s316_s2 + $0x40] ss:$0 sps:$4 sm:$0x77]   ;;  %v17_v23 = vand.u32 127, %v16_v22  ;;  %vm171_vm13 = vcmask 261120  }
   0xe   :  { %v126_v20 = vsel %vm124_vm2, %v125_v17, 0  ;;  %s249_s2 = smov [#allocation2]  }
   0xf   :  { %137 = vmatpush1.bf16.msra.mxu0 %v217_v12  ;;  %v128_v21 = vand.u32 %v222_v19, %v126_v20  ;;  %vm18_vm3 = vcmp.eq.s32.totalorder %v17_v23, 18  ;;  %s179_s9 = sshll.u32 %s249_s2, 4  ;;  %s180_s9 = int_to_ptr.vmem [resolvable:$true] %s179_s9 }
  0x10   :  { %138 = vmatprep.subr.bf16.mxu0 %v245_v2  ;;  %s223_s10 = scalar_lea.vmem %s180_s9, 256  ;;  %p228_p1 = scmp.lt.s32.totalorder %s180_s9, %s180_s9 }
  0x11   :  { %p224_p0 = scmp.ne.s32.totalorder %s180_s9, %s223_s10  ;;  %p229_p2 = scmp.lt.s32.totalorder %s223_s10, %s223_s10 }
  0x13   :  { %139 = vmatpush1.bf16.msra.mxu0 %v218_v13  ;;  %p230_p3 = por %p229_p2, %p228_p1 }
  0x14   :  { %140 = vmatprep.subr.bf16.mxu0 %v245_v2 }
  0x15   :  { %p231_p4 = pnand %p230_p3, %p224_p0 }
  0x17   :  { %141 = vmatpush1.bf16.msra.mxu0 %v219_v14 }
  0x18   :  { %142 = vmatprep.subr.bf16.mxu0 %v245_v2 }
  0x1b   :  { %143 = vmatpush1.bf16.msra.mxu0 %v220_v15 }
  0x1c   :  { %144 = vmatprep.subr.bf16.mxu0 %v245_v2 }
  0x1f   :  { %145 = vmatpush1.bf16.msra.mxu0 %v221_v18 }
  0x20   :  { %160 = vmatprep.subr.bf16.mxu0 %v245_v2 }
  0x23   :  { %161 = vmatpush2.bf16.msra.mxu0 %v128_v21 }
  0x7d   :  { %v23_v24 = vpop.permute.xlu0 %22 }
  0x7e   :  { %vm27_vm4 = vcmp.eq.s32.totalorder %v17_v23, %v23_v24 }
  0x7f   :  { %v35_v25 = vpop.permute.xlu1 %34  ;;  %vm29_vm5 = vmor %vm18_vm3, %vm27_vm4 }
  0x80   :  { %vm39_vm6 = vcmp.eq.s32.totalorder %v17_v23, %v35_v25 }
  0x81   :  { %v26_v26 = vpop.permute.xlu0 %25  ;;  %vm41_vm7 = vmor %vm29_vm5, %vm39_vm6 }
  0x82   :  { %vm28_vm8 = vcmp.eq.s32.totalorder %v17_v23, %v26_v26 }
  0x83   :  { %v38_v27 = vpop.permute.xlu1 %37  ;;  %vm30_vm9 = vmor %vm18_vm3, %vm28_vm8 }
  0x84   :  { %vm40_vm10 = vcmp.eq.s32.totalorder %v17_v23, %v38_v27 }
  0x85   :  { %vm42_vm11 = vmor %vm30_vm9, %vm40_vm10 }
  0x86   :  { %vm202_vm12 = vmpackc.low %vm42_vm11, %vm41_vm7 }
  0x87   :  { %203 = vmatmul.mubr.msk.bf16.vlgmr.msra.gmra.mxu0 %vm202_vm12, %v248_v28 }
 0x147   :  { %v164_v29 = vpop.f32.mrf.mxu0 }
 0x148   :  { %172 = vst.msk [vmem:[#allocation2] sm:$0xff] %vm171_vm13, %v164_v29 }
 0x149   :  { %v166_v30 = vpop.f32.mrf.mxu0 }
 0x14b   :  { %v167_v31 = vpop.f32.mrf.mxu0 }
 0x14c   :  { %173 = vst.msk [vmem:[#allocation2 + $0x8] sm:$0xff] %vm171_vm13, %v167_v31 }
 0x14d   :  { %v169_v32 = vpop.f32.mrf.mxu0 }
 0x14e   :  { %234 = shalt.err (!%p231_p4)
}
 0x14f   :  { %s250_s11 = smov 128   ;;  %s251_s12 = smov 8  }
 0x150   :  { %185 = dma.vmem_to_hbm [thread:$0]  %s180_s9, 256, %s317_s3, [#allocation3], %s250_s11, %s250_s11, %s251_s12  }
 0x151   :  { %243 = dma.done.wait [#allocation3], 256  }
 0x152   :  { %244 = vsyncadd [#allocation3], 4294967040 }
 0x153   :  { %189 = vsyncpa [#allocation3], 1 }

</bundles_post_ra>
